<compile_context>
chip_gen: v7x
topology: tpu7x:2x2x1
jax: 0.10.0
libtpu: 0.0.40
codegen_flags: <defaults>
</compile_context>

<pallas_src>
import functools

import jax
import jax.numpy as jnp
from jax.experimental import pallas as pl
from jax.experimental.pallas import tpu as pltpu


def _round_up(x, m):
    return ((x + m - 1) // m) * m


def _decoder_lstm_kernel(x_ref, h0_ref, c0_ref, w_ref, b_ref, wout_ref, bout_ref,
                         out_ref, hT_ref, cT_ref,
                         h_sc, c_sc, xh_sc, *, in_pad, h_pad):
    """One grid step = one LSTM timestep + linear head.

    x_ref   : (1, 1, In_pad)      per-step input row (block over time)
    h0/c0   : (1, H_pad)          initial state (constant block, read at t==0)
    w_ref   : (In_pad+H_pad, 4*H_pad)  stacked [W_ih^T ; W_hh^T], gate-lane-aligned
    b_ref   : (1, 4*H_pad)        combined gate bias
    wout_ref: (H_pad, Out_pad)    head weight (transposed)
    bout_ref: (1, Out_pad)        head bias
    out_ref : (1, 1, Out_pad)     per-step output row
    hT/cT   : (1, H_pad)          final state (constant block, resident)
    h_sc/c_sc/xh_sc : VMEM scratch (recurrent state + fused-matmul input)
    """
    t = pl.program_id(0)

    @pl.when(t == 0)
    def _():
        h_sc[...] = h0_ref[...]
        c_sc[...] = c0_ref[...]

    x = x_ref[0]                     # (1, In_pad)
    h = h_sc[...]                    # (1, H_pad)
    c = c_sc[...]                    # (1, H_pad)

    # Fused gate matmul: [x | h] @ W_stacked  -> (1, 4*H_pad)
    xh_sc[:, :in_pad] = x
    xh_sc[:, in_pad:] = h
    gates = (jnp.dot(xh_sc[...], w_ref[...], preferred_element_type=jnp.float32)
             + b_ref[...])

    # Each gate starts on a 128-lane boundary (H_pad multiple of 128).
    i_g = jax.nn.sigmoid(gates[:, 0 * h_pad:1 * h_pad])
    f_g = jax.nn.sigmoid(gates[:, 1 * h_pad:2 * h_pad])
    g_g = jnp.tanh(gates[:, 2 * h_pad:3 * h_pad])
    o_g = jax.nn.sigmoid(gates[:, 3 * h_pad:4 * h_pad])

    c_new = f_g * c + i_g * g_g
    h_new = o_g * jnp.tanh(c_new)

    # Linear head: (1, H_pad) @ (H_pad, Out_pad) + bias
    out = (jnp.dot(h_new, wout_ref[...], preferred_element_type=jnp.float32)
           + bout_ref[...])

    out_ref[0] = out.astype(out_ref.dtype)
    h_sc[...] = h_new
    c_sc[...] = c_new
    hT_ref[...] = h_new.astype(hT_ref.dtype)
    cT_ref[...] = c_new.astype(cT_ref.dtype)


def decoder_rnn_decode(x_seq, hidden, params):
    """Run T LSTM steps + linear head inside ONE pallas_call.

    x_seq : (T, output_size)  inputs, one row per timestep
    hidden: (h, c), each reshapeable to (hidden_size,)
    Returns (outputs (T, output_size), (h_T (1,1,H), c_T (1,1,H)))
    """
    h, c = hidden
    H = params["hidden_size"]
    Out = params["output_size"]
    Hp, InP, OutP = params["H_pad"], params["In_pad"], params["Out_pad"]
    T = x_seq.shape[0]

    x_pad = jnp.zeros((T, 1, InP), jnp.float32)
    x_pad = x_pad.at[:, 0, :Out].set(jnp.reshape(x_seq, (T, Out)).astype(jnp.float32))
    h_pad = jnp.zeros((1, Hp), jnp.float32).at[:, :H].set(
        jnp.reshape(h, (1, H)).astype(jnp.float32))
    c_pad = jnp.zeros((1, Hp), jnp.float32).at[:, :H].set(
        jnp.reshape(c, (1, H)).astype(jnp.float32))

    # Advisory cost for XLA scheduling around the custom call.
    flops = T * (2 * (InP + Hp) * 4 * Hp + 2 * Hp * OutP)
    transcendentals = T * 5 * Hp
    bytes_accessed = 4 * ((InP + Hp) * 4 * Hp + 4 * Hp + Hp * OutP + OutP
                          + 4 * Hp + T * (InP + OutP))

    kernel = functools.partial(_decoder_lstm_kernel, in_pad=InP, h_pad=Hp)

    outs_pad, hT_pad, cT_pad = pl.pallas_call(
        kernel,
        out_shape=(
            jax.ShapeDtypeStruct((T, 1, OutP), jnp.float32),
            jax.ShapeDtypeStruct((1, Hp), jnp.float32),
            jax.ShapeDtypeStruct((1, Hp), jnp.float32),
        ),
        grid=(T,),
        in_specs=[
            pl.BlockSpec((1, 1, InP), lambda t: (t, 0, 0)),          # x_t
            pl.BlockSpec((1, Hp), lambda t: (0, 0)),                 # h0
            pl.BlockSpec((1, Hp), lambda t: (0, 0)),                 # c0
            pl.BlockSpec((InP + Hp, 4 * Hp), lambda t: (0, 0)),      # W_stacked
            pl.BlockSpec((1, 4 * Hp), lambda t: (0, 0)),             # b_gates
            pl.BlockSpec((Hp, OutP), lambda t: (0, 0)),              # W_out^T
            pl.BlockSpec((1, OutP), lambda t: (0, 0)),               # b_out
        ],
        out_specs=(
            pl.BlockSpec((1, 1, OutP), lambda t: (t, 0, 0)),         # per-step output
            pl.BlockSpec((1, Hp), lambda t: (0, 0)),                 # h_T (resident)
            pl.BlockSpec((1, Hp), lambda t: (0, 0)),                 # c_T (resident)
        ),
        scratch_shapes=[
            pltpu.VMEM((1, Hp), jnp.float32),                        # h state
            pltpu.VMEM((1, Hp), jnp.float32),                        # c state
            pltpu.VMEM((1, InP + Hp), jnp.float32),                  # [x|h] buffer
        ],
        compiler_params=pltpu.CompilerParams(
            dimension_semantics=("arbitrary",)),                     # recurrence => sequential
        cost_estimate=pl.CostEstimate(
            flops=flops, transcendentals=transcendentals,
            bytes_accessed=bytes_accessed),
    )(x_pad, h_pad, c_pad,
      params["w_stacked"], params["b_gates"],
      params["w_out_p"], params["b_out_p"])

    outs = outs_pad[:, 0, :Out]
    h1 = hT_pad[:, :H].reshape(1, 1, H)
    c1 = cT_pad[:, :H].reshape(1, 1, H)
    return outs, (h1, c1)


def decoder_rnn_forward(inp, hidden, params):
    """Pallas equivalent of DecoderRNN.forward (single step, T=1)."""
    out_size = params["output_size"]
    x_seq = jnp.reshape(inp, (1, out_size))          # view(1, 1, -1) semantics
    outs, new_hidden = decoder_rnn_decode(x_seq, hidden, params)
    return outs[0], new_hidden                       # (output_size,), ((1,1,H),(1,1,H))


def init_params(key, hidden_size, output_size):
    """PyTorch-shaped weights plus padded/stacked/transposed kernel layouts."""
    k = jax.random.split(key, 6)
    bound = 1.0 / jnp.sqrt(hidden_size)
    u = lambda kk, shape: jax.random.uniform(kk, shape, jnp.float32, -bound, bound)

    # PyTorch shapes: weight_ih (4H, In), weight_hh (4H, H), biases (4H,);
    # Linear: (Out, H), (Out,).  Gate order [i, f, g, o].
    w_ih = u(k[0], (4 * hidden_size, output_size))
    w_hh = u(k[1], (4 * hidden_size, hidden_size))
    b_ih = u(k[2], (4 * hidden_size,))
    b_hh = u(k[3], (4 * hidden_size,))
    w_out = u(k[4], (output_size, hidden_size))
    b_out = u(k[5], (output_size,))

    H = hidden_size
    Hp = _round_up(hidden_size, 128)
    InP = _round_up(output_size, 128)
    OutP = _round_up(output_size, 128)

    # Stacked, transposed, gate-lane-aligned weights: gate g lives in columns
    # [g*Hp, g*Hp + H); rows [0, In) are W_ih^T, rows [InP, InP+H) are W_hh^T.
    w_ih_t = w_ih.T                                   # (In, 4H)
    w_hh_t = w_hh.T                                   # (H, 4H)
    w_stacked = jnp.zeros((InP + Hp, 4 * Hp), jnp.float32)
    b_gates = jnp.zeros((1, 4 * Hp), jnp.float32)
    for g in range(4):
        w_stacked = w_stacked.at[:output_size, g * Hp:g * Hp + H].set(
            w_ih_t[:, g * H:(g + 1) * H])
        w_stacked = w_stacked.at[InP:InP + H, g * Hp:g * Hp + H].set(
            w_hh_t[:, g * H:(g + 1) * H])
        b_gates = b_gates.at[0, g * Hp:g * Hp + H].set(
            b_ih[g * H:(g + 1) * H] + b_hh[g * H:(g + 1) * H])

    w_out_p = jnp.zeros((Hp, OutP), jnp.float32).at[:H, :output_size].set(w_out.T)
    b_out_p = jnp.zeros((1, OutP), jnp.float32).at[0, :output_size].set(b_out)

    return {
        "hidden_size": hidden_size, "output_size": output_size,
        "H_pad": Hp, "In_pad": InP, "Out_pad": OutP,
        # kernel layouts
        "w_stacked": w_stacked, "b_gates": b_gates,
        "w_out_p": w_out_p, "b_out_p": b_out_p,
        # raw PyTorch-shape weights (for the pure-JAX reference)
        "w_ih": w_ih, "w_hh": w_hh, "b_ih": b_ih, "b_hh": b_hh,
        "w_out": w_out, "b_out": b_out,
    }


def _reference_forward(inp, hidden, params):
    """Pure-JAX reference of one forward step (PyTorch LSTM + Linear)."""
    h, c = hidden
    H = params["hidden_size"]
    x = jnp.reshape(inp, (1, -1)).astype(jnp.float32)
    h2 = jnp.reshape(h, (1, H)).astype(jnp.float32)
    c2 = jnp.reshape(c, (1, H)).astype(jnp.float32)
    gates = (x @ params["w_ih"].T + h2 @ params["w_hh"].T
             + params["b_ih"] + params["b_hh"])
    i_g = jax.nn.sigmoid(gates[:, 0 * H:1 * H])
    f_g = jax.nn.sigmoid(gates[:, 1 * H:2 * H])
    g_g = jnp.tanh(gates[:, 2 * H:3 * H])
    o_g = jax.nn.sigmoid(gates[:, 3 * H:4 * H])
    c_new = f_g * c2 + i_g * g_g
    h_new = o_g * jnp.tanh(c_new)
    out = h_new @ params["w_out"].T + params["b_out"]
    return out[0], (h_new.reshape(1, 1, H), c_new.reshape(1, 1, H))


def _reference_decode(x_seq, hidden, params):
    outs = []
    for t in range(x_seq.shape[0]):
        o, hidden = _reference_forward(x_seq[t], hidden, params)
        outs.append(o)
    return jnp.stack(outs), hidden


if __name__ == "__main__":
    hidden_size = 32
    output_size = 8
    T = 6

    key = jax.random.PRNGKey(0)
    kp, kx, kh, kc, ks = jax.random.split(key, 5)
    params = init_params(kp, hidden_size, output_size)

    # --- single-step forward (DecoderRNN.forward) ---
    x = jax.random.normal(kx, (output_size,), jnp.float32)
    h0 = jax.random.normal(kh, (1, 1, hidden_size), jnp.float32)
    c0 = jax.random.normal(kc, (1, 1, hidden_size), jnp.float32)

    out, (h1, c1) = decoder_rnn_forward(x, (h0, c0), params)
    jax.block_until_ready((out, h1, c1))

    out_r, (h1_r, c1_r) = _reference_forward(x, (h0, c0), params)
    assert out.shape == (output_size,)
    assert h1.shape == (1, 1, hidden_size) and c1.shape == (1, 1, hidden_size)
    assert jnp.allclose(out, out_r, atol=1e-5, rtol=1e-5)
    assert jnp.allclose(h1, h1_r, atol=1e-5, rtol=1e-5)
    assert jnp.allclose(c1, c1_r, atol=1e-5, rtol=1e-5)

    # --- fused multi-step decode (T steps in one pallas_call) ---
    x_seq = jax.random.normal(ks, (T, output_size), jnp.float32)
    outs, (hT, cT) = decoder_rnn_decode(x_seq, (h0, c0), params)
    jax.block_until_ready((outs, hT, cT))

    outs_r, (hT_r, cT_r) = _reference_decode(x_seq, (h0, c0), params)
    assert outs.shape == (T, output_size)
    assert jnp.allclose(outs, outs_r, atol=1e-5, rtol=1e-5)
    assert jnp.allclose(hT, hT_r, atol=1e-5, rtol=1e-5)
    assert jnp.allclose(cT, cT_r, atol=1e-5, rtol=1e-5)

    print("KERNEL_OK")
</pallas_src>

<mosaic_0001>
module attributes {stable_mosaic.version = 11 : i64} {
  func.func @_decoder_lstm_kernel(%arg0: i32, %arg1: memref<1x1x128xf32, #tpu.memory_space<vmem>>, %arg2: memref<1x128xf32, #tpu.memory_space<vmem>>, %arg3: memref<1x128xf32, #tpu.memory_space<vmem>>, %arg4: memref<256x512xf32, #tpu.memory_space<vmem>>, %arg5: memref<1x512xf32, #tpu.memory_space<vmem>>, %arg6: memref<128x128xf32, #tpu.memory_space<vmem>>, %arg7: memref<1x128xf32, #tpu.memory_space<vmem>>, %arg8: memref<1x1x128xf32, #tpu.memory_space<vmem>>, %arg9: memref<1x128xf32, #tpu.memory_space<vmem>>, %arg10: memref<1x128xf32, #tpu.memory_space<vmem>>, %arg11: memref<1x128xf32, #tpu.memory_space<vmem>>, %arg12: memref<1x128xf32, #tpu.memory_space<vmem>>, %arg13: memref<1x256xf32, #tpu.memory_space<vmem>>) attributes {dimension_semantics = [#tpu.dimension_semantics<arbitrary>], iteration_bounds = array<i64: 1>, scalar_prefetch = 0 : i64, scratch_operands = 3 : i64, tpu.core_type = #tpu.core_type<tc>, window_params = [{transform_indices = @transform_0, window_bounds = array<i64: 1, 1, 128>}, {pipeline_mode = #tpu.pipeline_mode<synchronous>, transform_indices = @transform_1, window_bounds = array<i64: 1, 128>}, {pipeline_mode = #tpu.pipeline_mode<synchronous>, transform_indices = @transform_2, window_bounds = array<i64: 1, 128>}, {pipeline_mode = #tpu.pipeline_mode<synchronous>, transform_indices = @transform_3, window_bounds = array<i64: 256, 512>}, {pipeline_mode = #tpu.pipeline_mode<synchronous>, transform_indices = @transform_4, window_bounds = array<i64: 1, 512>}, {pipeline_mode = #tpu.pipeline_mode<synchronous>, transform_indices = @transform_5, window_bounds = array<i64: 128, 128>}, {pipeline_mode = #tpu.pipeline_mode<synchronous>, transform_indices = @transform_6, window_bounds = array<i64: 1, 128>}, {transform_indices = @transform_7, window_bounds = array<i64: 1, 1, 128>}, {pipeline_mode = #tpu.pipeline_mode<synchronous>, transform_indices = @transform_8, window_bounds = array<i64: 1, 128>}, {pipeline_mode = #tpu.pipeline_mode<synchronous>, transform_indices = @transform_9, window_bounds = array<i64: 1, 128>}]} {
    %c0_i32 = arith.constant 0 : i32
    %0 = arith.cmpi eq, %arg0, %c0_i32 : i32
    %1 = arith.extui %0 : i1 to i32
    %c0_i32_0 = arith.constant 0 : i32
    %2 = arith.cmpi ne, %1, %c0_i32_0 : i32
    scf.if %2 {
      %c0_35 = arith.constant 0 : index
      %c0_36 = arith.constant 0 : index
      %50 = vector.load %arg2[%c0_35, %c0_36] : memref<1x128xf32, #tpu.memory_space<vmem>>, vector<1x128xf32>
      %c0_37 = arith.constant 0 : index
      %c0_38 = arith.constant 0 : index
      %51 = vector.load %arg11[%c0_37, %c0_38] : memref<1x128xf32, #tpu.memory_space<vmem>>, vector<1x128xf32>
      tpu.vector_store %arg11[%c0_37, %c0_38], %50 {strides = array<i32>} : memref<1x128xf32, #tpu.memory_space<vmem>>, vector<1x128xf32>,
      %c0_39 = arith.constant 0 : index
      %c0_40 = arith.constant 0 : index
      %52 = vector.load %arg3[%c0_39, %c0_40] : memref<1x128xf32, #tpu.memory_space<vmem>>, vector<1x128xf32>
      %c0_41 = arith.constant 0 : index
      %c0_42 = arith.constant 0 : index
      %53 = vector.load %arg12[%c0_41, %c0_42] : memref<1x128xf32, #tpu.memory_space<vmem>>, vector<1x128xf32>
      tpu.vector_store %arg12[%c0_41, %c0_42], %52 {strides = array<i32>} : memref<1x128xf32, #tpu.memory_space<vmem>>, vector<1x128xf32>,
    } else {
    }
    %c0 = arith.constant 0 : index
    %c0_1 = arith.constant 0 : index
    %c0_2 = arith.constant 0 : index
    %3 = vector.load %arg1[%c0, %c0_1, %c0_2] : memref<1x1x128xf32, #tpu.memory_space<vmem>>, vector<1x1x128xf32>
    %4 = vector.shape_cast %3 : vector<1x1x128xf32> to vector<1x128xf32>
    %c0_3 = arith.constant 0 : index
    %c0_4 = arith.constant 0 : index
    %5 = vector.load %arg11[%c0_3, %c0_4] : memref<1x128xf32, #tpu.memory_space<vmem>>, vector<1x128xf32>
    %c0_5 = arith.constant 0 : index
    %c0_6 = arith.constant 0 : index
    %6 = vector.load %arg12[%c0_5, %c0_6] : memref<1x128xf32, #tpu.memory_space<vmem>>, vector<1x128xf32>
    %c0_7 = arith.constant 0 : index
    %c0_8 = arith.constant 0 : index
    %7 = vector.load %arg13[%c0_7, %c0_8] : memref<1x256xf32, #tpu.memory_space<vmem>>, vector<1x128xf32>
    tpu.vector_store %arg13[%c0_7, %c0_8], %4 {strides = array<i32>} : memref<1x256xf32, #tpu.memory_space<vmem>>, vector<1x128xf32>,
    %c0_9 = arith.constant 0 : index
    %c128 = arith.constant 128 : index
    %8 = vector.load %arg13[%c0_9, %c128] : memref<1x256xf32, #tpu.memory_space<vmem>>, vector<1x128xf32>
    tpu.vector_store %arg13[%c0_9, %c128], %5 {strides = array<i32>} : memref<1x256xf32, #tpu.memory_space<vmem>>, vector<1x128xf32>,
    %c0_10 = arith.constant 0 : index
    %c0_11 = arith.constant 0 : index
    %9 = vector.load %arg13[%c0_10, %c0_11] : memref<1x256xf32, #tpu.memory_space<vmem>>, vector<1x256xf32>
    %c0_12 = arith.constant 0 : index
    %c0_13 = arith.constant 0 : index
    %10 = vector.load %arg4[%c0_12, %c0_13] : memref<256x512xf32, #tpu.memory_space<vmem>>, vector<256x512xf32>
    %cst = arith.constant dense<0.000000e+00> : vector<1x512xf32>
    %11 = tpu.matmul %9, %10, %cst {dimension_numbers = #tpu.dot_dimension_numbers<[1], [0], [0], [1], [0, 0, 1, 1], [], []>} : vector<1x256xf32>, vector<256x512xf32>, vector<1x512xf32> -> vector<1x512xf32>
    %c0_14 = arith.constant 0 : index
    %c0_15 = arith.constant 0 : index
    %12 = vector.load %arg5[%c0_14, %c0_15] : memref<1x512xf32, #tpu.memory_space<vmem>>, vector<1x512xf32>
    %13 = arith.addf %11, %12 : vector<1x512xf32>
    %14 = vector.extract_strided_slice %13 {offsets = [0, 0], sizes = [1, 128], strides = [1, 1]} : vector<1x512xf32> to vector<1x128xf32>
    %15 = arith.negf %14 : vector<1x128xf32>
    %16 = math.exp %15 : vector<1x128xf32>
    %cst_16 = arith.constant 1.000000e+00 : f32
    %17 = vector.broadcast %cst_16 : f32 to vector<1x128xf32>
    %18 = arith.addf %17, %16 : vector<1x128xf32>
    %19 = arith.divf %17, %18 : vector<1x128xf32>
    %20 = vector.extract_strided_slice %13 {offsets = [0, 128], sizes = [1, 128], strides = [1, 1]} : vector<1x512xf32> to vector<1x128xf32>
    %21 = arith.negf %20 : vector<1x128xf32>
    %22 = math.exp %21 : vector<1x128xf32>
    %cst_17 = arith.constant 1.000000e+00 : f32
    %23 = vector.broadcast %cst_17 : f32 to vector<1x128xf32>
    %24 = arith.addf %23, %22 : vector<1x128xf32>
    %25 = arith.divf %23, %24 : vector<1x128xf32>
    %26 = vector.extract_strided_slice %13 {offsets = [0, 256], sizes = [1, 128], strides = [1, 1]} : vector<1x512xf32> to vector<1x128xf32>
    %27 = math.tanh %26 : vector<1x128xf32>
    %28 = vector.extract_strided_slice %13 {offsets = [0, 384], sizes = [1, 128], strides = [1, 1]} : vector<1x512xf32> to vector<1x128xf32>
    %29 = arith.negf %28 : vector<1x128xf32>
    %30 = math.exp %29 : vector<1x128xf32>
    %cst_18 = arith.constant 1.000000e+00 : f32
    %31 = vector.broadcast %cst_18 : f32 to vector<1x128xf32>
    %32 = arith.addf %31, %30 : vector<1x128xf32>
    %33 = arith.divf %31, %32 : vector<1x128xf32>
    %34 = arith.mulf %25, %6 : vector<1x128xf32>
    %35 = arith.mulf %19, %27 : vector<1x128xf32>
    %36 = arith.addf %34, %35 : vector<1x128xf32>
    %37 = math.tanh %36 : vector<1x128xf32>
    %38 = arith.mulf %33, %37 : vector<1x128xf32>
    %c0_19 = arith.constant 0 : index
    %c0_20 = arith.constant 0 : index
    %39 = vector.load %arg6[%c0_19, %c0_20] : memref<128x128xf32, #tpu.memory_space<vmem>>, vector<128x128xf32>
    %cst_21 = arith.constant dense<0.000000e+00> : vector<1x128xf32>
    %40 = tpu.matmul %38, %39, %cst_21 {dimension_numbers = #tpu.dot_dimension_numbers<[1], [0], [0], [1], [0, 0, 1, 1], [], []>} : vector<1x128xf32>, vector<128x128xf32>, vector<1x128xf32> -> vector<1x128xf32>
    %c0_22 = arith.constant 0 : index
    %c0_23 = arith.constant 0 : index
    %41 = vector.load %arg7[%c0_22, %c0_23] : memref<1x128xf32, #tpu.memory_space<vmem>>, vector<1x128xf32>
    %42 = arith.addf %40, %41 : vector<1x128xf32>
    %c0_24 = arith.constant 0 : index
    %c0_25 = arith.constant 0 : index
    %c0_26 = arith.constant 0 : index
    %43 = vector.load %arg8[%c0_24, %c0_25, %c0_26] : memref<1x1x128xf32, #tpu.memory_space<vmem>>, vector<1x1x128xf32>
    %44 = vector.shape_cast %43 : vector<1x1x128xf32> to vector<1x128xf32>
    %45 = vector.shape_cast %42 : vector<1x128xf32> to vector<1x1x128xf32>
    tpu.vector_store %arg8[%c0_24, %c0_25, %c0_26], %45 {strides = array<i32>} : memref<1x1x128xf32, #tpu.memory_space<vmem>>, vector<1x1x128xf32>,
    %c0_27 = arith.constant 0 : index
    %c0_28 = arith.constant 0 : index
    %46 = vector.load %arg11[%c0_27, %c0_28] : memref<1x128xf32, #tpu.memory_space<vmem>>, vector<1x128xf32>
    tpu.vector_store %arg11[%c0_27, %c0_28], %38 {strides = array<i32>} : memref<1x128xf32, #tpu.memory_space<vmem>>, vector<1x128xf32>,
    %c0_29 = arith.constant 0 : index
    %c0_30 = arith.constant 0 : index
    %47 = vector.load %arg12[%c0_29, %c0_30] : memref<1x128xf32, #tpu.memory_space<vmem>>, vector<1x128xf32>
    tpu.vector_store %arg12[%c0_29, %c0_30], %36 {strides = array<i32>} : memref<1x128xf32, #tpu.memory_space<vmem>>, vector<1x128xf32>,
    %c0_31 = arith.constant 0 : index
    %c0_32 = arith.constant 0 : index
    %48 = vector.load %arg9[%c0_31, %c0_32] : memref<1x128xf32, #tpu.memory_space<vmem>>, vector<1x128xf32>
    tpu.vector_store %arg9[%c0_31, %c0_32], %38 {strides = array<i32>} : memref<1x128xf32, #tpu.memory_space<vmem>>, vector<1x128xf32>,
    %c0_33 = arith.constant 0 : index
    %c0_34 = arith.constant 0 : index
    %49 = vector.load %arg10[%c0_33, %c0_34] : memref<1x128xf32, #tpu.memory_space<vmem>>, vector<1x128xf32>
    tpu.vector_store %arg10[%c0_33, %c0_34], %36 {strides = array<i32>} : memref<1x128xf32, #tpu.memory_space<vmem>>, vector<1x128xf32>,
    return
  }
  func.func @transform_0(%arg0: i32) -> (i32, i32, i32) {
    %c0_i32 = arith.constant 0 : i32
    %c0_i32_0 = arith.constant 0 : i32
    %c0_i32_1 = arith.constant 0 : i32
    return %arg0, %c0_i32, %c0_i32_0 : i32, i32, i32
  }
  func.func @transform_1(%arg0: i32) -> (i32, i32) {
    %c0_i32 = arith.constant 0 : i32
    %c0_i32_0 = arith.constant 0 : i32
    %c0_i32_1 = arith.constant 0 : i32
    return %c0_i32, %c0_i32_0 : i32, i32
  }
  func.func @transform_2(%arg0: i32) -> (i32, i32) {
    %c0_i32 = arith.constant 0 : i32
    %c0_i32_0 = arith.constant 0 : i32
    %c0_i32_1 = arith.constant 0 : i32
    return %c0_i32, %c0_i32_0 : i32, i32
  }
  func.func @transform_3(%arg0: i32) -> (i32, i32) {
    %c0_i32 = arith.constant 0 : i32
    %c0_i32_0 = arith.constant 0 : i32
    %c0_i32_1 = arith.constant 0 : i32
    return %c0_i32, %c0_i32_0 : i32, i32
  }
  func.func @transform_4(%arg0: i32) -> (i32, i32) {
    %c0_i32 = arith.constant 0 : i32
    %c0_i32_0 = arith.constant 0 : i32
    %c0_i32_1 = arith.constant 0 : i32
    return %c0_i32, %c0_i32_0 : i32, i32
  }
  func.func @transform_5(%arg0: i32) -> (i32, i32) {
    %c0_i32 = arith.constant 0 : i32
    %c0_i32_0 = arith.constant 0 : i32
    %c0_i32_1 = arith.constant 0 : i32
    return %c0_i32, %c0_i32_0 : i32, i32
  }
  func.func @transform_6(%arg0: i32) -> (i32, i32) {
    %c0_i32 = arith.constant 0 : i32
    %c0_i32_0 = arith.constant 0 : i32
    %c0_i32_1 = arith.constant 0 : i32
    return %c0_i32, %c0_i32_0 : i32, i32
  }
  func.func @transform_7(%arg0: i32) -> (i32, i32, i32) {
    %c0_i32 = arith.constant 0 : i32
    %c0_i32_0 = arith.constant 0 : i32
    %c0_i32_1 = arith.constant 0 : i32
    return %arg0, %c0_i32, %c0_i32_0 : i32, i32, i32
  }
  func.func @transform_8(%arg0: i32) -> (i32, i32) {
    %c0_i32 = arith.constant 0 : i32
    %c0_i32_0 = arith.constant 0 : i32
    %c0_i32_1 = arith.constant 0 : i32
    return %c0_i32, %c0_i32_0 : i32, i32
  }
  func.func @transform_9(%arg0: i32) -> (i32, i32) {
    %c0_i32 = arith.constant 0 : i32
    %c0_i32_0 = arith.constant 0 : i32
    %c0_i32_1 = arith.constant 0 : i32
    return %c0_i32, %c0_i32_0 : i32, i32
  }
}

</mosaic_0001>

<bundles_post_ra>
// kernel: tpu_custom_call.1
= control target key start
LH: loop header
LB: loop body
LE: loop exit
PB: predicated region body
PF: predicated region fallthrough
CT: control target
= control target key end

     0   :  { %15 = vsyncpa [#allocation6], 0  ;;  %s1097_s0 = inlined_call_operand.hbm [shape: f32[1,1,128], index: 0, kind: input, shape index: {}]   ;;  %s1098_s1 = inlined_call_operand.vmem [shape: f32[1,128], index: 1, kind: input, shape index: {}]   ;;  %s1099_s2 = inlined_call_operand.vmem [shape: f32[1,128], index: 2, kind: input, shape index: {}]   ;;  %s1100_s3 = inlined_call_operand.hbm [shape: f32[256,512], index: 3, kind: input, shape index: {}]   ;;  %s1101_s4 = inlined_call_operand.vmem [shape: f32[1,512], index: 4, kind: input, shape index: {}]   ;;  %s1102_s5 = inlined_call_operand.hbm [shape: f32[128,128], index: 5, kind: input, shape index: {}]   ;;  %s1103_s6 = inlined_call_operand.vmem [shape: f32[1,128], index: 6, kind: input, shape index: {}]   ;;  %s1104_s7 = inlined_call_operand.hbm [shape: f32[1,1,128], index: 7, kind: output, shape index: {0}]   ;;  %s1105_s8 = inlined_call_operand.hbm [shape: f32[1,128], index: 8, kind: output, shape index: {1}]   ;;  %s1106_s9 = inlined_call_operand.hbm [shape: f32[1,128], index: 9, kind: output, shape index: {2}]  }
   0x1   :  { %16 = vsyncpa [#allocation9], 0 }
   0x2   :  { %17 = vsyncpa [#allocation7], 0 }
   0x3   :  { %18 = vsyncpa [#allocation13], 0  ;;  %s926_s30 = smov [#allocation8]   ;;  %s786_s13 = scalar_lea.hbm %s1100_s3, 16384 }
   0x4   :  { %s38_s10 = sshll.u32 %s926_s30, 4  ;;  %p787_p0 = scmp.ne.s32.totalorder %s1100_s3, %s786_s13  ;;  %s39_s10 = int_to_ptr.vmem [resolvable:$true] %s38_s10 }
   0x5   :  { %p790_p1 = scmp.lt.u32.totalorder %s786_s13, %s1100_s3 }
   0x7   :  { %p792_p2 = pnand %p790_p1, %p787_p0 }
   0x9   :  { %795 = shalt.err (!%p792_p2)
}
   0xa   :  { %s796_s18 = scalar_lea.vmem %s39_s10, 16384  ;;  %p801_p4 = scmp.lt.s32.totalorder %s39_s10, %s39_s10 }
   0xb   :  { %p797_p3 = scmp.ne.s32.totalorder %s39_s10, %s796_s18  ;;  %p802_p5 = scmp.lt.s32.totalorder %s796_s18, %s796_s18 }
   0xd   :  { %p803_p6 = por %p802_p5, %p801_p4 }
   0xf   :  { %p804_p7 = pnand %p803_p6, %p797_p3 }
  0x11   :  { %807 = shalt.err (!%p804_p7)
}
  0x12   :  { %s927_s19 = smov 512   ;;  %s928_s20 = smov 32  }
  0x13   :  { %44 = dma.hbm_to_vmem [thread:$0]  %s1100_s3, 16384, %s39_s10, [#allocation9], %s927_s19, %s927_s19, %s928_s20  }
  0x14   :  { %s929_s23 = smov [#allocation5]   ;;  %s930_s25 = smov [#allocation10]  }
  0x15   :  { %s25_s24 = sshll.u32 %s929_s23, 4  ;;  %s52_s26 = sshll.u32 %s930_s25, 4  ;;  %s26_s24 = int_to_ptr.vmem [resolvable:$true] %s25_s24  ;;  %s53_s26 = int_to_ptr.vmem [resolvable:$true] %s52_s26 }
  0x16   :  { %s808_s29 = scalar_lea.hbm %s1097_s0, 16 }
  0x17   :  { %p809_p8 = scmp.ne.s32.totalorder %s1097_s0, %s808_s29  ;;  %p812_p9 = scmp.lt.u32.totalorder %s808_s29, %s1097_s0 }
  0x19   :  { %p814_p10 = pnand %p812_p9, %p809_p8 }
  0x1b   :  { %817 = shalt.err (!%p814_p10)
}
  0x1c   :  { %s818_s3 = scalar_lea.vmem %s26_s24, 16  ;;  %s822_s10 = scalar_lea.vmem %s26_s24, 32 }
  0x1d   :  { %p819_p11 = scmp.ne.s32.totalorder %s26_s24, %s818_s3  ;;  %p823_p12 = scmp.lt.s32.totalorder %s26_s24, %s26_s24 }
  0x1e   :  { %p824_p13 = scmp.lt.s32.totalorder %s822_s10, %s818_s3 }
  0x20   :  { %p825_p0 = por %p824_p13, %p823_p12 }
  0x22   :  { %p826_p1 = pnand %p825_p0, %p819_p11 }
  0x24   :  { %829 = shalt.err (!%p826_p1)
}
  0x25   :  { %28 = dma.hbm_to_vmem [thread:$0]  %s1097_s0, 16, %s26_s24, [#allocation6]  }
  0x26   :  { %s830_s18 = scalar_lea.hbm %s1102_s5, 2048 }
  0x27   :  { %p831_p2 = scmp.ne.s32.totalorder %s1102_s5, %s830_s18  ;;  %p834_p3 = scmp.lt.u32.totalorder %s830_s18, %s1102_s5 }
  0x29   :  { %p836_p4 = pnand %p834_p3, %p831_p2 }
  0x2b   :  { %839 = shalt.err (!%p836_p4)
}
  0x2c   :  { %s840_s23 = scalar_lea.vmem %s53_s26, 2048  ;;  %p845_p6 = scmp.lt.s32.totalorder %s53_s26, %s53_s26 }
  0x2d   :  { %p841_p5 = scmp.ne.s32.totalorder %s53_s26, %s840_s23  ;;  %p846_p7 = scmp.lt.s32.totalorder %s840_s23, %s840_s23 }
  0x2f   :  { %p847_p8 = por %p846_p7, %p845_p6 }
  0x31   :  { %p848_p9 = pnand %p847_p8, %p841_p5 }
  0x33   :  { %851 = shalt.err (!%p848_p9)
}
  0x34   :  { %s931_s0 = smov 128   ;;  %s932_s24 = smov 8  }
  0x35   :  { %58 = dma.hbm_to_vmem [thread:$0]  %s1102_s5, 2048, %s53_s26, [#allocation9], %s931_s0, %s931_s0, %s932_s24  }
  0x36   :  { %918 = dma.done.wait [#allocation6], 16  }
  0x37   :  { %919 = vsyncadd [#allocation6], 4294967280 }
  0x38   :  { %920 = dma.done.wait [#allocation9], 18432  }
  0x39   :  { %921 = vsyncadd [#allocation9], 4294948864  ;;  %v89_v0 = vld [vmem:[#allocation8 + $0x8] sm:$0xff]  ;;  %v88_v2 = vld [vmem:[#allocation8] sm:$0xff]  ;;  %vm934_vm1 = vmmov 0  }
  0x3a   :  { %v93_v1 = vld [vmem:[#allocation8 + $0x28] sm:$0xff]  ;;  %v92_v4 = vld [vmem:[#allocation8 + $0x20] sm:$0xff]  ;;  %v91_v18 = vld [vmem:[#allocation8 + $0x18] sm:$0xff] }
  0x3b   :  { %v605_v3 = vpack.c.bf16 %v93_v1, %v89_v0  ;;  %v97_v5 = vld [vmem:[#allocation8 + $0x48] sm:$0xff]  ;;  %v607_v7 = vpack.c.bf16 %v92_v4, %v88_v2  ;;  %v96_v9 = vld [vmem:[#allocation8 + $0x40] sm:$0xff]  ;;  %v95_v19 = vld [vmem:[#allocation8 + $0x38] sm:$0xff] }
  0x3c   :  { %v101_v6 = vld [vmem:[#allocation8 + $0x68] sm:$0xff]  ;;  %v100_v10 = vld [vmem:[#allocation8 + $0x60] sm:$0xff]  ;;  %v669_v21 = vpack.c.bf16 %v95_v19, %v91_v18  ;;  %v90_v22 = vld [vmem:[#allocation8 + $0x10] sm:$0xff] }
  0x3d   :  { %v609_v8 = vpack.c.bf16 %v101_v6, %v97_v5  ;;  %v105_v11 = vld [vmem:[#allocation8 + $0x88] sm:$0xff]  ;;  %606 = vmatprep.subr.bf16.mxu0 %v605_v3  ;;  %v611_v13 = vpack.c.bf16 %v100_v10, %v96_v9  ;;  %v104_v14 = vld [vmem:[#allocation8 + $0x80] sm:$0xff]  ;;  %v94_v23 = vld [vmem:[#allocation8 + $0x30] sm:$0xff] }
  0x3e   :  { %v109_v12 = vld [vmem:[#allocation8 + $0xa8] sm:$0xff]  ;;  %608 = vmatpush1.bf16.msra.mxu0 %v607_v7  ;;  %v108_v15 = vld [vmem:[#allocation8 + $0xa0] sm:$0xff]  ;;  %v671_v24 = vpack.c.bf16 %v94_v23, %v90_v22  ;;  %670 = vmatprep.subr.bf16.mxu1 %v669_v21  ;;  %v99_v26 = vld [vmem:[#allocation8 + $0x58] sm:$0xff] }
  0x3f   :  { %610 = vmatprep.subr.bf16.mxu0 %v609_v8  ;;  %v613_v16 = vpack.c.bf16 %v109_v12, %v105_v11  ;;  %v113_v17 = vld [vmem:[#allocation8 + $0xc8] sm:$0xff]  ;;  %v615_v25 = vpack.c.bf16 %v108_v15, %v104_v14  ;;  %v103_v27 = vld [vmem:[#allocation8 + $0x78] sm:$0xff]  ;;  %v98_v28 = vld [vmem:[#allocation8 + $0x50] sm:$0xff] }
  0x40   :  { %v117_v20 = vld [vmem:[#allocation8 + $0xe8] sm:$0xff]  ;;  %v112_v30 = vld [vmem:[#allocation8 + $0xc0] sm:$0xff]  ;;  %672 = vmatpush1.bf16.msra.mxu1 %v671_v24  ;;  %v673_v32 = vpack.c.bf16 %v103_v27, %v99_v26  ;;  %v102_v33 = vld [vmem:[#allocation8 + $0x70] sm:$0xff] }
  0x41   :  { %v617_v29 = vpack.c.bf16 %v117_v20, %v113_v17  ;;  %v116_v31 = vld [vmem:[#allocation8 + $0xe0] sm:$0xff]  ;;  %v121_v34 = vld [vmem:[#allocation8 + $0x108] sm:$0xff]  ;;  %v675_v36 = vpack.c.bf16 %v102_v33, %v98_v28  ;;  %v107_v37 = vld [vmem:[#allocation8 + $0x98] sm:$0xff] }
  0x42   :  { %612 = vmatpush1.bf16.msra.mxu0 %v611_v13  ;;  %v125_v35 = vld [vmem:[#allocation8 + $0x128] sm:$0xff]  ;;  %674 = vmatprep.subr.bf16.mxu1 %v673_v32  ;;  %v111_v38 = vld [vmem:[#allocation8 + $0xb8] sm:$0xff]  ;;  %v106_v39 = vld [vmem:[#allocation8 + $0x90] sm:$0xff]  ;;  %v619_v41 = vpack.c.bf16 %v116_v31, %v112_v30 }
  0x43   :  { %614 = vmatprep.subr.bf16.mxu0 %v613_v16  ;;  %v110_v40 = vld [vmem:[#allocation8 + $0xb0] sm:$0xff]  ;;  %v120_v42 = vld [vmem:[#allocation8 + $0x100] sm:$0xff]  ;;  %v677_v44 = vpack.c.bf16 %v111_v38, %v107_v37  ;;  %v621_v45 = vpack.c.bf16 %v125_v35, %v121_v34  ;;  %v129_v46 = vld [vmem:[#allocation8 + $0x148] sm:$0xff] }
  0x44   :  { %v124_v43 = vld [vmem:[#allocation8 + $0x120] sm:$0xff]  ;;  %676 = vmatpush1.bf16.msra.mxu1 %v675_v36  ;;  %v679_v47 = vpack.c.bf16 %v110_v40, %v106_v39  ;;  %v115_v48 = vld [vmem:[#allocation8 + $0xd8] sm:$0xff]  ;;  %v133_v50 = vld [vmem:[#allocation8 + $0x168] sm:$0xff] }
  0x45   :  { %v119_v49 = vld [vmem:[#allocation8 + $0xf8] sm:$0xff]  ;;  %678 = vmatprep.subr.bf16.mxu1 %v677_v44  ;;  %v114_v52 = vld [vmem:[#allocation8 + $0xd0] sm:$0xff]  ;;  %v623_v54 = vpack.c.bf16 %v124_v43, %v120_v42  ;;  %v625_v57 = vpack.c.bf16 %v133_v50, %v129_v46  ;;  %v128_v58 = vld [vmem:[#allocation8 + $0x140] sm:$0xff] }
  0x46   :  { %616 = vmatpush1.bf16.msra.mxu0 %v615_v25  ;;  %v681_v51 = vpack.c.bf16 %v119_v49, %v115_v48  ;;  %v118_v53 = vld [vmem:[#allocation8 + $0xf0] sm:$0xff]  ;;  %v123_v55 = vld [vmem:[#allocation8 + $0x118] sm:$0xff]  ;;  %v132_v59 = vld [vmem:[#allocation8 + $0x160] sm:$0xff] }
  0x47   :  { %618 = vmatprep.subr.bf16.mxu0 %v617_v29  ;;  %v127_v56 = vld [vmem:[#allocation8 + $0x138] sm:$0xff]  ;;  %v137_v60 = vld [vmem:[#allocation8 + $0x188] sm:$0xff]  ;;  %v683_v61 = vpack.c.bf16 %v118_v53, %v114_v52  ;;  %v122_v0 = vld [vmem:[#allocation8 + $0x110] sm:$0xff]  ;;  %v627_v4 = vpack.c.bf16 %v132_v59, %v128_v58 }
  0x48   :  { %680 = vmatpush1.bf16.msra.mxu1 %v679_v47  ;;  %v141_v62 = vld [vmem:[#allocation8 + $0x1a8] sm:$0xff]  ;;  %v685_v63 = vpack.c.bf16 %v127_v56, %v123_v55  ;;  %v126_v1 = vld [vmem:[#allocation8 + $0x130] sm:$0xff]  ;;  %v131_v2 = vld [vmem:[#allocation8 + $0x158] sm:$0xff] }
  0x49   :  { %682 = vmatprep.subr.bf16.mxu1 %v681_v51  ;;  %v135_v3 = vld [vmem:[#allocation8 + $0x178] sm:$0xff]  ;;  %v629_v5 = vpack.c.bf16 %v141_v62, %v137_v60  ;;  %v136_v6 = vld [vmem:[#allocation8 + $0x180] sm:$0xff]  ;;  %v145_v8 = vld [vmem:[#allocation8 + $0x1c8] sm:$0xff]  ;;  %v687_v9 = vpack.c.bf16 %v126_v1, %v122_v0 }
  0x4a   :  { %620 = vmatpush1.bf16.msra.mxu0 %v619_v41  ;;  %v140_v7 = vld [vmem:[#allocation8 + $0x1a0] sm:$0xff]  ;;  %v149_v10 = vld [vmem:[#allocation8 + $0x1e8] sm:$0xff]  ;;  %v689_v11 = vpack.c.bf16 %v135_v3, %v131_v2  ;;  %v130_v12 = vld [vmem:[#allocation8 + $0x150] sm:$0xff]  ;;  %v81_v41 = vlaneseq }
  0x4b   :  { %622 = vmatprep.subr.bf16.mxu0 %v621_v45  ;;  %v134_v13 = vld [vmem:[#allocation8 + $0x170] sm:$0xff]  ;;  %v139_v14 = vld [vmem:[#allocation8 + $0x198] sm:$0xff]  ;;  %v631_v16 = vpack.c.bf16 %v140_v7, %v136_v6  ;;  %v633_v17 = vpack.c.bf16 %v149_v10, %v145_v8  ;;  %v144_v18 = vld [vmem:[#allocation8 + $0x1c0] sm:$0xff] }
  0x4c   :  { %684 = vmatpush1.bf16.msra.mxu1 %v683_v61  ;;  %v143_v15 = vld [vmem:[#allocation8 + $0x1b8] sm:$0xff]  ;;  %v148_v19 = vld [vmem:[#allocation8 + $0x1e0] sm:$0xff]  ;;  %v153_v20 = vld [vmem:[#allocation8 + $0x208] sm:$0xff]  ;;  %v691_v21 = vpack.c.bf16 %v134_v13, %v130_v12  ;;  %vm1026_vm0 = vcmp.lt.s32.totalorder %v81_v41, 128 }
  0x4d   :  { %686 = vmatprep.subr.bf16.mxu1 %v685_v63  ;;  %v157_v22 = vld [vmem:[#allocation8 + $0x228] sm:$0xff]  ;;  %v693_v23 = vpack.c.bf16 %v143_v15, %v139_v14  ;;  %v138_v24 = vld [vmem:[#allocation8 + $0x190] sm:$0xff]  ;;  %v147_v26 = vld [vmem:[#allocation8 + $0x1d8] sm:$0xff]  ;;  %v635_v28 = vpack.c.bf16 %v148_v19, %v144_v18 }
  0x4e   :  { %624 = vmatpush1.bf16.msra.mxu0 %v623_v54  ;;  %v142_v25 = vld [vmem:[#allocation8 + $0x1b0] sm:$0xff]  ;;  %v151_v27 = vld [vmem:[#allocation8 + $0x1f8] sm:$0xff]  ;;  %v637_v29 = vpack.c.bf16 %v157_v22, %v153_v20  ;;  %v152_v30 = vld [vmem:[#allocation8 + $0x200] sm:$0xff] }
  0x4f   :  { %626 = vmatprep.subr.bf16.mxu0 %v625_v57  ;;  %v156_v31 = vld [vmem:[#allocation8 + $0x220] sm:$0xff]  ;;  %v161_v32 = vld [vmem:[#allocation8 + $0x248] sm:$0xff]  ;;  %v695_v33 = vpack.c.bf16 %v142_v25, %v138_v24  ;;  %v697_v35 = vpack.c.bf16 %v151_v27, %v147_v26  ;;  %v146_v36 = vld [vmem:[#allocation8 + $0x1d0] sm:$0xff] }
  0x50   :  { %688 = vmatpush1.bf16.msra.mxu1 %v687_v9  ;;  %v165_v34 = vld [vmem:[#allocation8 + $0x268] sm:$0xff]  ;;  %v150_v37 = vld [vmem:[#allocation8 + $0x1f0] sm:$0xff]  ;;  %v155_v38 = vld [vmem:[#allocation8 + $0x218] sm:$0xff]  ;;  %v639_v40 = vpack.c.bf16 %v156_v31, %v152_v30 }
  0x51   :  { %690 = vmatprep.subr.bf16.mxu1 %v689_v11  ;;  %v159_v39 = vld [vmem:[#allocation8 + $0x238] sm:$0xff]  ;;  %v641_v42 = vpack.c.bf16 %v165_v34, %v161_v32  ;;  %v160_v43 = vld [vmem:[#allocation8 + $0x240] sm:$0xff]  ;;  %v169_v45 = vld [vmem:[#allocation8 + $0x288] sm:$0xff]  ;;  %v699_v46 = vpack.c.bf16 %v150_v37, %v146_v36 }
  0x52   :  { %628 = vmatpush1.bf16.msra.mxu0 %v627_v4  ;;  %v164_v44 = vld [vmem:[#allocation8 + $0x260] sm:$0xff]  ;;  %v173_v47 = vld [vmem:[#allocation8 + $0x2a8] sm:$0xff]  ;;  %v701_v48 = vpack.c.bf16 %v159_v39, %v155_v38  ;;  %v154_v49 = vld [vmem:[#allocation8 + $0x210] sm:$0xff] }
  0x53   :  { %630 = vmatprep.subr.bf16.mxu0 %v629_v5  ;;  %v158_v50 = vld [vmem:[#allocation8 + $0x230] sm:$0xff]  ;;  %v163_v51 = vld [vmem:[#allocation8 + $0x258] sm:$0xff]  ;;  %v643_v53 = vpack.c.bf16 %v164_v44, %v160_v43  ;;  %v168_v54 = vld [vmem:[#allocation8 + $0x280] sm:$0xff]  ;;  %v645_v57 = vpack.c.bf16 %v173_v47, %v169_v45 }
  0x54   :  { %692 = vmatpush1.bf16.msra.mxu1 %v691_v21  ;;  %v167_v52 = vld [vmem:[#allocation8 + $0x278] sm:$0xff]  ;;  %v172_v55 = vld [vmem:[#allocation8 + $0x2a0] sm:$0xff]  ;;  %v177_v58 = vld [vmem:[#allocation8 + $0x2c8] sm:$0xff]  ;;  %v703_v60 = vpack.c.bf16 %v158_v50, %v154_v49 }
  0x55   :  { %694 = vmatprep.subr.bf16.mxu1 %v693_v23  ;;  %v181_v59 = vld [vmem:[#allocation8 + $0x2e8] sm:$0xff]  ;;  %v162_v61 = vld [vmem:[#allocation8 + $0x250] sm:$0xff]  ;;  %v705_v62 = vpack.c.bf16 %v167_v52, %v163_v51  ;;  %v78_v1 = vld [vmem:[#allocation5] sm:$0x1]  ;;  %v647_v4 = vpack.c.bf16 %v172_v55, %v168_v54 }
  0x56   :  { %632 = vmatpush1.bf16.msra.mxu0 %v631_v16  ;;  %v166_v63 = vld [vmem:[#allocation8 + $0x270] sm:$0xff]  ;;  %v171_v2 = vld [vmem:[#allocation8 + $0x298] sm:$0xff]  ;;  %85 = vst.msk [vmem:[#allocation4] sm:$0x1] %vm1026_vm0, %v78_v1  ;;  %v649_v5 = vpack.c.bf16 %v181_v59, %v177_v58  ;;  %v176_v6 = vld [vmem:[#allocation8 + $0x2c0] sm:$0xff] }
  0x57   :  { %634 = vmatprep.subr.bf16.mxu0 %v633_v17  ;;  %v74_v0 = vld [vmem:[%s1098_s1] sm:$0x1]  ;;  %v175_v3 = vld [vmem:[#allocation8 + $0x2b8] sm:$0xff]  ;;  %v180_v7 = vld [vmem:[#allocation8 + $0x2e0] sm:$0xff]  ;;  %v707_v9 = vpack.c.bf16 %v166_v63, %v162_v61 }
  0x58   :  { %696 = vmatpush1.bf16.msra.mxu1 %v695_v33  ;;  %75 = vst [vmem:[#allocation2] sm:$0x1] %v74_v0  ;;  %v185_v8 = vld [vmem:[#allocation8 + $0x308] sm:$0xff]  ;;  %v709_v11 = vpack.c.bf16 %v175_v3, %v171_v2  ;;  %v170_v12 = vld [vmem:[#allocation8 + $0x290] sm:$0xff]  ;;  %v179_v14 = vld [vmem:[#allocation8 + $0x2d8] sm:$0xff]  ;;  %v651_v16 = vpack.c.bf16 %v180_v7, %v176_v6 }
  0x59   :  { %698 = vmatprep.subr.bf16.mxu1 %v697_v35  ;;  %v189_v10 = vld [vmem:[#allocation8 + $0x328] sm:$0xff]  ;;  %v174_v13 = vld [vmem:[#allocation8 + $0x2b0] sm:$0xff]  ;;  %v183_v15 = vld [vmem:[#allocation8 + $0x2f8] sm:$0xff] }
  0x5a   :  { %636 = vmatpush1.bf16.msra.mxu0 %v635_v28  ;;  %v184_v17 = vld [vmem:[#allocation8 + $0x300] sm:$0xff]  ;;  %v653_v18 = vpack.c.bf16 %v189_v10, %v185_v8  ;;  %v193_v20 = vld [vmem:[#allocation8 + $0x348] sm:$0xff]  ;;  %v711_v22 = vpack.c.bf16 %v174_v13, %v170_v12  ;;  %v713_v23 = vpack.c.bf16 %v183_v15, %v179_v14  ;;  %v178_v24 = vld [vmem:[#allocation8 + $0x2d0] sm:$0xff]  ;;  %v933_v14 = vmov 0.0|0.0  }
  0x5b   :  { %638 = vmatprep.subr.bf16.mxu0 %v637_v29  ;;  %v188_v19 = vld [vmem:[#allocation8 + $0x320] sm:$0xff]  ;;  %v197_v21 = vld [vmem:[#allocation8 + $0x368] sm:$0xff]  ;;  %v182_v25 = vld [vmem:[#allocation8 + $0x2f0] sm:$0xff]  ;;  %v1038_v29 = vshrl.u32 %v81_v41, 7 }
  0x5c   :  { %700 = vmatpush1.bf16.msra.mxu1 %v699_v46  ;;  %v187_v27 = vld [vmem:[#allocation8 + $0x318] sm:$0xff]  ;;  %v655_v30 = vpack.c.bf16 %v188_v19, %v184_v17  ;;  %v657_v31 = vpack.c.bf16 %v197_v21, %v193_v20  ;;  %v192_v32 = vld [vmem:[#allocation8 + $0x340] sm:$0xff]  ;;  %v715_v34 = vpack.c.bf16 %v182_v25, %v178_v24  ;;  %v201_v35 = vld [vmem:[#allocation8 + $0x388] sm:$0xff] }
  0x5d   :  { %702 = vmatprep.subr.bf16.mxu1 %v701_v48  ;;  %v191_v28 = vld [vmem:[#allocation8 + $0x338] sm:$0xff]  ;;  %v196_v33 = vld [vmem:[#allocation8 + $0x360] sm:$0xff]  ;;  %v205_v36 = vld [vmem:[#allocation8 + $0x3a8] sm:$0xff]  ;;  %v224_v38 = vsub.s32 1, %v1038_v29 }
  0x5e   :  { %640 = vmatpush1.bf16.msra.mxu0 %v639_v40  ;;  %v717_v37 = vpack.c.bf16 %v191_v28, %v187_v27  ;;  %v186_v39 = vld [vmem:[#allocation8 + $0x310] sm:$0xff]  ;;  %v195_v41 = vld [vmem:[#allocation8 + $0x358] sm:$0xff]  ;;  %v661_v44 = vpack.c.bf16 %v205_v36, %v201_v35  ;;  %v200_v45 = vld [vmem:[#allocation8 + $0x380] sm:$0xff] }
  0x5f   :  { %642 = vmatprep.subr.bf16.mxu0 %v641_v42  ;;  %v79_v26 = vld [vmem:[#allocation2] sm:$0x1]  ;;  %v190_v40 = vld [vmem:[#allocation8 + $0x330] sm:$0xff]  ;;  %v659_v42 = vpack.c.bf16 %v196_v33, %v192_v32  ;;  %v204_v46 = vld [vmem:[#allocation8 + $0x3a0] sm:$0xff] }
  0x60   :  { %704 = vmatpush1.bf16.msra.mxu1 %v703_v60  ;;  %86 = vst.msk [vmem:[#allocation4 + $0x1] sm:$0x1] %vm1026_vm0, %v79_v26  ;;  %v199_v43 = vld [vmem:[#allocation8 + $0x378] sm:$0xff]  ;;  %v209_v47 = vld [vmem:[#allocation8 + $0x3c8] sm:$0xff]  ;;  %v719_v50 = vpack.c.bf16 %v190_v40, %v186_v39  ;;  %v198_v54 = vld [vmem:[#allocation8 + $0x370] sm:$0xff]  ;;  %v663_v55 = vpack.c.bf16 %v204_v46, %v200_v45 }
  0x61   :  { %706 = vmatprep.subr.bf16.mxu1 %v705_v62  ;;  %v213_v48 = vld [vmem:[#allocation8 + $0x3e8] sm:$0xff]  ;;  %v721_v52 = vpack.c.bf16 %v199_v43, %v195_v41  ;;  %v203_v56 = vld [vmem:[#allocation8 + $0x398] sm:$0xff]  ;;  %v208_v59 = vld [vmem:[#allocation8 + $0x3c0] sm:$0xff]  ;;  %v220_v62 = vsub.s32 0, %v1038_v29 }
  0x62   :  { %644 = vmatpush1.bf16.msra.mxu0 %v643_v53  ;;  %v194_v53 = vld [vmem:[#allocation8 + $0x350] sm:$0xff]  ;;  %v665_v58 = vpack.c.bf16 %v213_v48, %v209_v47  ;;  %v212_v60 = vld [vmem:[#allocation8 + $0x3e0] sm:$0xff]  ;;  %v211_v3 = vld [vmem:[#allocation8 + $0x3d8] sm:$0xff] }
  0x63   :  { %646 = vmatprep.subr.bf16.mxu0 %v645_v57  ;;  %v207_v57 = vld [vmem:[#allocation8 + $0x3b8] sm:$0xff]  ;;  %v723_v61 = vpack.c.bf16 %v198_v54, %v194_v53  ;;  %v202_v0 = vld [vmem:[#allocation8 + $0x390] sm:$0xff]  ;;  %v667_v2 = vpack.c.bf16 %v212_v60, %v208_v59  ;;  %v416_v12 = vld [vmem:[#allocation10 + $0x8] sm:$0xff] }
  0x64   :  { %708 = vmatpush1.bf16.msra.mxu1 %v707_v9  ;;  %v725_v63 = vpack.c.bf16 %v207_v57, %v203_v56  ;;  %v206_v1 = vld [vmem:[#allocation8 + $0x3b0] sm:$0xff]  ;;  %v419_v19 = vld [vmem:[#allocation10 + $0x20] sm:$0xff]  ;;  %v420_v20 = vld [vmem:[#allocation10 + $0x28] sm:$0xff] }
  0x65   :  { %710 = vmatprep.subr.bf16.mxu1 %v709_v11  ;;  %v210_v8 = vld [vmem:[#allocation8 + $0x3d0] sm:$0xff]  ;;  %v415_v11 = vld [vmem:[#allocation10] sm:$0xff]  ;;  %v740_v21 = vpack.c.bf16 %v420_v20, %v419_v19  ;;  %v424_v26 = vld [vmem:[#allocation10 + $0x48] sm:$0xff] }
  0x66   :  { %648 = vmatpush1.bf16.msra.mxu0 %v647_v4  ;;  %v215_v4 = vld [vmem:[#allocation8 + $0x3f8] sm:$0xff]  ;;  %v214_v9 = vld [vmem:[#allocation8 + $0x3f0] sm:$0xff]  ;;  %v734_v13 = vpack.c.bf16 %v416_v12, %v415_v11  ;;  %v423_v25 = vld [vmem:[#allocation10 + $0x40] sm:$0xff] }
  0x67   :  { %650 = vmatprep.subr.bf16.mxu0 %v649_v5  ;;  %v87_v49 = vld [vmem:[#allocation4] sm:$0x3]  ;;  %v727_v5 = vpack.c.bf16 %v206_v1, %v202_v0  ;;  %v729_v7 = vpack.c.bf16 %v215_v4, %v211_v3  ;;  %v731_v10 = vpack.c.bf16 %v214_v9, %v210_v8  ;;  %v417_v15 = vld [vmem:[#allocation10 + $0x10] sm:$0xff]  ;;  %v746_v27 = vpack.c.bf16 %v424_v26, %v423_v25  ;;  %v427_v32 = vld [vmem:[#allocation10 + $0x60] sm:$0xff] }
  0x68   :  { %712 = vmatpush1.bf16.msra.mxu1 %v711_v22  ;;  %v225_v51 = vrot.slane %v87_v49, %v224_v38  ;;  %v221_v6 = vrot.slane %v87_v49, %v220_v62  ;;  %v76_v17 = vld [vmem:[%s1099_s2] sm:$0x1]  ;;  %v428_v33 = vld [vmem:[#allocation10 + $0x68] sm:$0xff] }
  0x69   :  { %714 = vmatprep.subr.bf16.mxu1 %v713_v23  ;;  %77 = vst [vmem:[#allocation3] sm:$0x1] %v76_v17  ;;  %v421_v22 = vld [vmem:[#allocation10 + $0x30] sm:$0xff]  ;;  %v422_v23 = vld [vmem:[#allocation10 + $0x38] sm:$0xff]  ;;  %v752_v35 = vpack.c.bf16 %v428_v33, %v427_v32 }
  0x6a   :  { %652 = vmatpush1.bf16.msra.mxu0 %v651_v16  ;;  %313 = vmatprep.mubr.f32.mxu0 %v225_v51  ;;  %v418_v16 = vld [vmem:[#allocation10 + $0x18] sm:$0xff]  ;;  %v743_v24 = vpack.c.bf16 %v422_v23, %v421_v22  ;;  %v425_v28 = vld [vmem:[#allocation10 + $0x50] sm:$0xff] }
  0x6b   :  { %654 = vmatprep.subr.bf16.mxu0 %v653_v18  ;;  %384 = vmatprep.mubr.f32.mxu1 %v225_v51  ;;  %v737_v18 = vpack.c.bf16 %v418_v16, %v417_v15  ;;  %v429_v36 = vld [vmem:[#allocation10 + $0x70] sm:$0xff] }
  0x6c   :  { %716 = vmatpush1.bf16.msra.mxu1 %v715_v34  ;;  %v935_v34 = vmov 0.0   ;;  %v216_v40 = vld [vmem:[%s1101_s4] sm:$0xf]  ;;  %s936_s4 = smov [#allocation12]  }
  0x6d   :  { %718 = vmatprep.subr.bf16.mxu1 %v717_v37  ;;  %v430_v37 = vld [vmem:[#allocation10 + $0x78] sm:$0xff]  ;;  %v236_v41 = vrot.slane %v216_v40, %v224_v38  ;;  %s523_s30 = sshll.u32 %s936_s4, 4  ;;  %s524_s30 = int_to_ptr.vmem [resolvable:$true] %s523_s30 }
  0x6e   :  { %656 = vmatpush1.bf16.msra.mxu0 %v655_v30  ;;  %v426_v30 = vld [vmem:[#allocation10 + $0x58] sm:$0xff]  ;;  %v755_v39 = vpack.c.bf16 %v430_v37, %v429_v36  ;;  %s852_s11 = scalar_lea.vmem %s524_s30, 16  ;;  %s856_s12 = scalar_lea.vmem %s524_s30, 32 }
  0x6f   :  { %658 = vmatprep.subr.bf16.mxu0 %v657_v31  ;;  %v749_v31 = vpack.c.bf16 %v426_v30, %v425_v28  ;;  %p853_p10 = scmp.ne.s32.totalorder %s524_s30, %s852_s11  ;;  %p857_p11 = scmp.lt.s32.totalorder %s524_s30, %s524_s30 }
  0x70   :  { %720 = vmatpush1.bf16.msra.mxu1 %v719_v50  ;;  %v239_v50 = vsub.s32 2, %v1038_v29  ;;  %p858_p12 = scmp.lt.s32.totalorder %s856_s12, %s852_s11 }
  0x71   :  { %722 = vmatprep.subr.bf16.mxu1 %v721_v52 }
  0x72   :  { %660 = vmatpush1.bf16.msra.mxu0 %v659_v42  ;;  %v232_v42 = vrot.slane %v216_v40, %v220_v62  ;;  %v240_v54 = vrot.slane %v216_v40, %v239_v50  ;;  %p859_p13 = por %p858_p12, %p857_p11 }
  0x73   :  { %662 = vmatprep.subr.bf16.mxu0 %v661_v44  ;;  %v243_v44 = vsub.s32 3, %v1038_v29  ;;  %v80_v29 = vld [vmem:[#allocation3] sm:$0x1] }
  0x74   :  { %724 = vmatpush1.bf16.msra.mxu1 %v723_v61  ;;  %p860_p0 = pnand %p859_p13, %p853_p10 }
  0x75   :  { %726 = vmatprep.subr.bf16.mxu1 %v725_v63  ;;  %v244_v51 = vrot.slane %v216_v40, %v243_v44 }
  0x76   :  { %664 = vmatpush1.bf16.msra.mxu0 %v663_v55 }
  0x77   :  { %666 = vmatprep.subr.bf16.mxu0 %v665_v58 }
  0x78   :  { %728 = vmatpush1.bf16.msra.mxu1 %v727_v5 }
  0x79   :  { %730 = vmatprep.subr.bf16.mxu1 %v729_v7 }
  0x7a   :  { %668 = vmatpush1.bf16.msra.mxu0 %v667_v2 }
  0x7b   :  { %733 = vmatprep.subr.bf16.mxu0 %v933_v14 }
  0x7c   :  { %732 = vmatpush1.bf16.msra.mxu1 %v731_v10 }
  0x7d   :  { %314 = vmatmul.mubr.f32.vlgmr.msra.gmra.mrb[0].mxu0 %v221_v6 }
  0x7e   :  { %735 = vmatpush3.bf16.msra.mxu0 %v734_v13  ;;  %602 = vmatprep.mubr.msk.f32.mxu0 %vm934_vm1, %v935_v34 }
  0x7f   :  { %385 = vmatmul.mubr.f32.vlgmr.msra.gmra.mrb[0].mxu1 %v221_v6  ;;  %736 = vmatprep.subr.bf16.mxu0 %v933_v14 }
  0x82   :  { %738 = vmatpush3.bf16.msra.mxu0 %v737_v18 }
  0x83   :  { %739 = vmatprep.subr.bf16.mxu0 %v933_v14 }
  0x86   :  { %741 = vmatpush3.bf16.msra.mxu0 %v740_v21 }
  0x87   :  { %742 = vmatprep.subr.bf16.mxu0 %v933_v14 }
  0x8a   :  { %744 = vmatpush3.bf16.msra.mxu0 %v743_v24 }
  0x8b   :  { %745 = vmatprep.subr.bf16.mxu0 %v933_v14 }
  0x8e   :  { %747 = vmatpush3.bf16.msra.mxu0 %v746_v27 }
  0x8f   :  { %748 = vmatprep.subr.bf16.mxu0 %v933_v14 }
  0x92   :  { %750 = vmatpush3.bf16.msra.mxu0 %v749_v31 }
  0x93   :  { %751 = vmatprep.subr.bf16.mxu0 %v933_v14 }
  0x96   :  { %753 = vmatpush3.bf16.msra.mxu0 %v752_v35 }
  0x97   :  { %754 = vmatprep.subr.bf16.mxu0 %v933_v14 }
  0x9a   :  { %756 = vmatpush3.bf16.msra.mxu0 %v755_v39 }
 0x150   :  { %v315_v43 = vpop.f32.mrb[0].mxu0 }
 0x151   :  { %v316_v45 = vadd.f32 %v315_v43, %v232_v42  ;;  %v317_v46 = vpop.f32.mrb[1].mxu0 }
 0x152   :  { %v318_v47 = vadd.f32 %v317_v46, %v236_v41  ;;  %v386_v52 = vpop.f32.mrb[0].mxu1 }
 0x153   :  { %v550_v48 = vmul.f32 -1.442695, %v316_v45  ;;  %v388_v53 = vpop.f32.mrb[1].mxu1  ;;  %v387_v57 = vadd.f32 %v386_v52, %v240_v54 }
 0x154   :  { %v551_v49 = vmul.f32 -1.442695, %v318_v47  ;;  %v389_v55 = vadd.f32 %v388_v53, %v244_v51 }
 0x155   :  { %770 = vpow2.f32 %v550_v48 }
 0x156   :  { %772 = vpow2.f32 %v551_v49  ;;  %v552_v56 = vmul.f32 -1.442695, %v389_v55 }
 0x158   :  { %774 = vpow2.f32 %v552_v56 }
 0x159   :  { %776 = vtanh.f32 %v387_v57 }
 0x15f   :  { %v771_v38 = vpop.eup %770 }
 0x160   :  { %v773_v58 = vpop.eup %772  ;;  %v394_v59 = vadd.f32 1.0, %v771_v38 }
 0x161   :  { %v400_v60 = vadd.f32 1.0, %v773_v58 }
 0x162   :  { %778 = vrcp.f32 %v394_v59  ;;  %v775_v61 = vpop.eup %774 }
 0x163   :  { %780 = vrcp.f32 %v400_v60  ;;  %v777_v62 = vpop.eup %776  ;;  %v407_v0 = vadd.f32 1.0, %v775_v61 }
 0x165   :  { %782 = vrcp.f32 %v407_v0 }
 0x16c   :  { %v779_v63 = vpop.eup %778 }
 0x16d   :  { %v781_v1 = vpop.eup %780  ;;  %v411_v2 = vmul.f32 %v779_v63, %v777_v62 }
 0x16e   :  { %v410_v3 = vmul.f32 %v781_v1, %v80_v29 }
 0x16f   :  { %v783_v5 = vpop.eup %782 }
 0x170   :  { %v412_v4 = vadd.f32 %v411_v2, %v410_v3 }
 0x172   :  { %504 = vst [vmem:[#allocation3] sm:$0x1] %v412_v4  ;;  %506 = vst [vmem:[#allocation14] sm:$0x1] %v412_v4  ;;  %784 = vtanh.f32 %v412_v4 }
 0x17c   :  { %v785_v6 = vpop.eup %784 }
 0x17d   :  { %v414_v7 = vmul.f32 %v785_v6, %v783_v5 }
 0x17f   :  { %603 = vmatmul.mubr.f32.vlgmr.msra.gmra.mrb[2].mxu0 %v414_v7  ;;  %503 = vst [vmem:[#allocation2] sm:$0x1] %v414_v7  ;;  %505 = vst [vmem:[#allocation12] sm:$0x1] %v414_v7 }
 0x180   :  { %863 = shalt.err (!%p860_p0)
}
 0x181   :  { %s864_s10 = scalar_lea.hbm %s1105_s8, 16 }
 0x182   :  { %p865_p1 = scmp.ne.s32.totalorder %s1105_s8, %s864_s10  ;;  %p868_p2 = scmp.lt.u32.totalorder %s864_s10, %s1105_s8 }
 0x184   :  { %p870_p3 = pnand %p868_p2, %p865_p1 }
 0x186   :  { %873 = shalt.err (!%p870_p3)
}
 0x187   :  { %526 = dma.vmem_to_hbm [thread:$0]  %s524_s30, 16, %s1105_s8, [#allocation13]  }
 0x188   :  { %s937_s20 = smov [#allocation14]  }
 0x189   :  { %s533_s21 = sshll.u32 %s937_s20, 4  ;;  %s534_s21 = int_to_ptr.vmem [resolvable:$true] %s533_s21 }
 0x18a   :  { %s874_s22 = scalar_lea.vmem %s534_s21, 16  ;;  %s878_s23 = scalar_lea.vmem %s534_s21, 32 }
 0x18b   :  { %p875_p4 = scmp.ne.s32.totalorder %s534_s21, %s874_s22  ;;  %p879_p5 = scmp.lt.s32.totalorder %s534_s21, %s534_s21 }
 0x18c   :  { %p880_p6 = scmp.lt.s32.totalorder %s878_s23, %s874_s22 }
 0x18e   :  { %p881_p7 = por %p880_p6, %p879_p5 }
 0x190   :  { %p882_p8 = pnand %p881_p7, %p875_p4 }
 0x192   :  { %885 = shalt.err (!%p882_p8)
}
 0x193   :  { %s886_s25 = scalar_lea.hbm %s1106_s9, 16 }
 0x194   :  { %p887_p9 = scmp.ne.s32.totalorder %s1106_s9, %s886_s25  ;;  %p890_p10 = scmp.lt.u32.totalorder %s886_s25, %s1106_s9 }
 0x196   :  { %p892_p11 = pnand %p890_p10, %p887_p9 }
 0x198   :  { %895 = shalt.err (!%p892_p11)
}
 0x199   :  { %536 = dma.vmem_to_hbm [thread:$0]  %s534_s21, 16, %s1106_s9, [#allocation13]   ;;  %v431_v8 = vld [vmem:[%s1103_s6] sm:$0x1] }
 0x19a   :  { %s938_s4 = smov [#allocation11]  }
 0x19b   :  { %s513_s30 = sshll.u32 %s938_s4, 4  ;;  %s514_s30 = int_to_ptr.vmem [resolvable:$true] %s513_s30 }
 0x19c   :  { %s896_s11 = scalar_lea.vmem %s514_s30, 16  ;;  %s900_s12 = scalar_lea.vmem %s514_s30, 32 }
 0x19d   :  { %p897_p12 = scmp.ne.s32.totalorder %s514_s30, %s896_s11  ;;  %p901_p13 = scmp.lt.s32.totalorder %s514_s30, %s514_s30 }
 0x19e   :  { %p902_p0 = scmp.lt.s32.totalorder %s900_s12, %s896_s11 }
 0x1a0   :  { %p903_p1 = por %p902_p0, %p901_p13 }
 0x1a2   :  { %p904_p2 = pnand %p903_p1, %p897_p12 }
 0x252   :  { %v498_v9 = vpop.f32.mrb[2].mxu0 }
 0x253   :  { %v499_v10 = vadd.f32 %v498_v9, %v431_v8  ;;  %v604_v11 = vpop.f32.mrb[3].mxu0 }
 0x255   :  { %502 = vst [vmem:[#allocation11] sm:$0x1] %v499_v10 }
 0x256   :  { %907 = shalt.err (!%p904_p2)
}
 0x257   :  { %s908_s3 = scalar_lea.hbm %s1104_s7, 16 }
 0x258   :  { %p909_p3 = scmp.ne.s32.totalorder %s1104_s7, %s908_s3  ;;  %p912_p4 = scmp.lt.u32.totalorder %s908_s3, %s1104_s7 }
 0x25a   :  { %p914_p5 = pnand %p912_p4, %p909_p3 }
 0x25c   :  { %917 = shalt.err (!%p914_p5)
}
 0x25d   :  { %516 = dma.vmem_to_hbm [thread:$0]  %s514_s30, 16, %s1104_s7, [#allocation7]  }
 0x25e   :  { %922 = dma.done.wait [#allocation7], 16  }
 0x25f   :  { %923 = vsyncadd [#allocation7], 4294967280 }
 0x260   :  { %924 = dma.done.wait [#allocation13], 32  }
 0x261   :  { %925 = vsyncadd [#allocation13], 4294967264 }
 0x262   :  { %546 = vsyncpa [#allocation6], 1 }
 0x263   :  { %547 = vsyncpa [#allocation9], 1 }
 0x264   :  { %548 = vsyncpa [#allocation7], 1 }
 0x265   :  { %549 = vsyncpa [#allocation13], 1 }

</bundles_post_ra>
